<compile_context>
chip_gen: v5e
topology: v5e:2x2
jax: 0.10.0
libtpu: 0.0.40
codegen_flags: <defaults>
</compile_context>

<pallas_src>
import functools
import math

import jax
import jax.numpy as jnp
from jax.experimental import pallas as pl
from jax.experimental.pallas import tpu as pltpu


def _mlp_kernel(x_ref, w1_ref, b1_ref, w2_ref, b2_ref, o_ref, *scratch, mxu_dtype):
    # x_ref : (tm, C)    w1_ref : (C, tk)   b1_ref : (1, tk)
    # w2_ref: (tk, C)    b2_ref : (1, C)    o_ref  : (tm, C)
    # scratch: optional VMEM f32 (tm, C) accumulator; when the output dtype is
    # f32 we accumulate straight into the resident output block instead.
    acc_ref = scratch[0] if scratch else o_ref
    k = pl.program_id(1)

    @pl.when(k == 0)
    def _():
        acc_ref[...] = jnp.zeros_like(acc_ref)

    x = x_ref[...]
    w1 = w1_ref[...]
    if mxu_dtype is not None:
        x = x.astype(mxu_dtype)
        w1 = w1.astype(mxu_dtype)

    # fc chunk: x @ W1[:, k-chunk] + b1[k-chunk]  (f32 accumulate on the MXU)
    h = jnp.dot(x, w1, preferred_element_type=jnp.float32)
    h = h + b1_ref[...].astype(jnp.float32)

    # Exact GELU (matches torch.nn.functional.gelu default, erf-based), in f32.
    g = 0.5 * h * (1.0 + jax.lax.erf(h * (1.0 / math.sqrt(2.0))))

    # proj chunk: accumulate gelu(h_chunk) @ W2[k-chunk, :] into the resident accumulator.
    w2 = w2_ref[...]
    g_dt = mxu_dtype if mxu_dtype is not None else w2.dtype
    acc_ref[...] += jnp.dot(g.astype(g_dt), w2.astype(g_dt),
                            preferred_element_type=jnp.float32)

    @pl.when(k == pl.num_programs(1) - 1)
    def _():
        o_ref[...] = (acc_ref[...] + b2_ref[...].astype(jnp.float32)).astype(o_ref.dtype)


def _round_up(x, m):
    return ((x + m - 1) // m) * m


def _vmem_footprint(tm, tk, C, in_bytes, out_bytes, w_bytes, use_acc):
    # Double-buffered pipeline buffers + the resident f32 accumulator (if any).
    row = 2 * tm * C * in_bytes + 2 * tm * C * out_bytes
    if use_acc:
        row += tm * C * 4
    wgt = 2 * C * tk * w_bytes + 2 * tk * C * w_bytes
    return row + wgt, row, wgt


def mlp_pallas(x, w1, b1, w2, b2, *, mxu_dtype=None,
               tm_target=None, tk_target=None, vmem_limit_bytes=None):
    """x: (B, T, C); w1: (C, H); b1: (H,); w2: (H, C); b2: (C,). Returns (B, T, C).

    mxu_dtype: optional dtype to cast MXU operands to (e.g. jnp.bfloat16 for an
    f32 model). Accumulation stays f32. This is a precision change vs the exact
    torch f32 reference -- opt-in only.
    """
    B, T, C = x.shape
    H = w1.shape[1]
    M = B * T
    out_dtype = x.dtype
    use_acc = jnp.dtype(out_dtype) != jnp.dtype(jnp.float32)  # f32 out -> accumulate in o_ref

    in_bytes = jnp.dtype(x.dtype).itemsize
    out_bytes = jnp.dtype(out_dtype).itemsize
    w_bytes = jnp.dtype(w1.dtype).itemsize

    # Generation-dependent VMEM budget & tile targets (v5e/v6e: 128 MiB VMEM, v7x: 64 MiB).
    if vmem_limit_bytes is None:
        try:
            vmem_cap = int(pltpu.get_tpu_info().vmem_capacity_bytes)
        except Exception:
            vmem_cap = 64 << 20  # conservative (v7x-sized) fallback
        vmem_limit_bytes = max(32 << 20, min(vmem_cap - (16 << 20), 112 << 20))
    big_vmem = vmem_limit_bytes >= (96 << 20)
    if tm_target is None:
        tm_target = 1024 if big_vmem else 512
    if tk_target is None:
        tk_target = 1024 if big_vmem else 512

    # Row tile: sublane aligned; keep >= 2 row tiles so the "parallel" m axis
    # can still shard across both v7x TensorCores after raising tm.
    tm = min(tm_target, _round_up(M, 8))
    if M > 8 and -(-M // tm) < 2:
        tm = _round_up(-(-M // 2), 8)

    # Hidden-dim (reduction) tile: lane aligned unless it covers all of H.
    tk = H if H <= tk_target else max(128, (tk_target // 128) * 128)

    # Shrink tiles until the double-buffered footprint fits the VMEM budget.
    budget = int(0.85 * vmem_limit_bytes)
    while True:
        total, row, wgt = _vmem_footprint(tm, tk, C, in_bytes, out_bytes, w_bytes, use_acc)
        if total <= budget:
            break
        if tk > 128 and (wgt >= row or tm <= 8):
            tk = max(128, ((tk // 2) // 128) * 128)
        elif tm > 8:
            tm = max(8, _round_up(tm // 2, 8))
        else:
            break

    # Pad row / hidden dims to tile multiples. Padded rows are sliced away;
    # zero-padded hidden columns/rows contribute exactly 0 to the output.
    M_pad = _round_up(M, tm)
    H_pad = _round_up(H, tk)
    grid_m = M_pad // tm
    grid_k = H_pad // tk

    x2d = x.reshape(M, C)
    if M_pad != M:
        x2d = jnp.pad(x2d, ((0, M_pad - M), (0, 0)))
    if H_pad != H:
        w1 = jnp.pad(w1, ((0, 0), (0, H_pad - H)))
        b1 = jnp.pad(b1, ((0, H_pad - H),))
        w2 = jnp.pad(w2, ((0, H_pad - H), (0, 0)))
    b1_2d = b1.reshape(1, H_pad)
    b2_2d = b2.reshape(1, C)

    # Weight chunks are re-streamed from HBM once per row tile -> counted grid_m times.
    cost = pl.CostEstimate(
        flops=4 * M_pad * C * H_pad,                  # two matmuls, 2*M*C*H each
        transcendentals=M_pad * H_pad,                # erf per hidden activation
        bytes_accessed=(M_pad * C * (in_bytes + out_bytes)
                        + grid_m * 2 * C * H_pad * w_bytes
                        + grid_m * (H_pad + C) * w_bytes),
    )

    scratch_shapes = [pltpu.VMEM((tm, C), jnp.float32)] if use_acc else []

    out2d = pl.pallas_call(
        functools.partial(_mlp_kernel, mxu_dtype=mxu_dtype),
        out_shape=jax.ShapeDtypeStruct((M_pad, C), out_dtype),
        grid_spec=pltpu.PrefetchScalarGridSpec(
            num_scalar_prefetch=0,
            grid=(grid_m, grid_k),                              # reduction axis last
            in_specs=[
                pl.BlockSpec((tm, C), lambda m, k: (m, 0)),     # x row tile (resident across k)
                pl.BlockSpec((C, tk), lambda m, k: (0, k)),     # w1 K-chunk
                pl.BlockSpec((1, tk), lambda m, k: (0, k)),     # b1 K-chunk
                pl.BlockSpec((tk, C), lambda m, k: (k, 0)),     # w2 K-chunk
                pl.BlockSpec((1, C), lambda m, k: (0, 0)),      # b2 (epilogue only)
            ],
            out_specs=pl.BlockSpec((tm, C), lambda m, k: (m, 0)),  # constant over k -> resident
            scratch_shapes=scratch_shapes,
        ),
        compiler_params=pltpu.CompilerParams(
            dimension_semantics=("parallel", "arbitrary"),
            vmem_limit_bytes=int(vmem_limit_bytes),
        ),
        cost_estimate=cost,
    )(x2d, w1, b1_2d, w2, b2_2d)

    return out2d[:M].reshape(B, T, C)


if __name__ == "__main__":
    # Small config consistent with the module: n_embd=32 -> hidden_dim=128.
    B, T, C = 2, 8, 32
    H = 4 * C

    key = jax.random.PRNGKey(0)
    kx, kw1, kb1, kw2, kb2 = jax.random.split(key, 5)

    x = jax.random.normal(kx, (B, T, C), dtype=jnp.float32)
    # Deterministic synthetic parameters (nn.Linear-like scaling).
    w1 = jax.random.normal(kw1, (C, H), dtype=jnp.float32) * (1.0 / math.sqrt(C))
    b1 = jax.random.normal(kb1, (H,), dtype=jnp.float32) * 0.01
    w2 = jax.random.normal(kw2, (H, C), dtype=jnp.float32) * (1.0 / math.sqrt(H))
    b2 = jax.random.normal(kb2, (C,), dtype=jnp.float32) * 0.01

    # Pure-JAX reference (exact erf GELU, same as torch F.gelu default).
    h_ref = x.reshape(-1, C) @ w1 + b1
    g_ref = 0.5 * h_ref * (1.0 + jax.lax.erf(h_ref / math.sqrt(2.0)))
    y_ref = (g_ref @ w2 + b2).reshape(B, T, C)

    # Default path: exact f32 matmuls, matches the torch reference tightly.
    y = mlp_pallas(x, w1, b1, w2, b2)
    jax.block_until_ready(y)
    assert jnp.allclose(y, y_ref, atol=1e-4, rtol=1e-4), "mismatch vs reference (f32 path)"

    # Opt-in fast path: bf16 MXU operands, f32 accumulation (precision change).
    y_fast = mlp_pallas(x, w1, b1, w2, b2, mxu_dtype=jnp.bfloat16)
    jax.block_until_ready(y_fast)
    assert jnp.allclose(y_fast, y_ref, atol=5e-2, rtol=5e-2), "mismatch vs reference (bf16 MXU path)"

    print("KERNEL_OK")
</pallas_src>

<mosaic_0001>
module attributes {stable_mosaic.version = 11 : i64} {
  func.func @_mlp_kernel(%arg0: i32, %arg1: i32, %arg2: memref<8x32xf32, #tpu.memory_space<vmem>>, %arg3: memref<32x128xf32, #tpu.memory_space<vmem>>, %arg4: memref<1x128xf32, #tpu.memory_space<vmem>>, %arg5: memref<128x32xf32, #tpu.memory_space<vmem>>, %arg6: memref<1x32xf32, #tpu.memory_space<vmem>>, %arg7: memref<8x32xf32, #tpu.memory_space<vmem>>) attributes {dimension_semantics = [#tpu.dimension_semantics<parallel>, #tpu.dimension_semantics<arbitrary>], iteration_bounds = array<i64: 2, 1>, scalar_prefetch = 0 : i64, scratch_operands = 0 : i64, tpu.core_type = #tpu.core_type<tc>, window_params = [{transform_indices = @transform_0, window_bounds = array<i64: 8, 32>}, {transform_indices = @transform_1, window_bounds = array<i64: 32, 128>}, {transform_indices = @transform_2, window_bounds = array<i64: 1, 128>}, {transform_indices = @transform_3, window_bounds = array<i64: 128, 32>}, {pipeline_mode = #tpu.pipeline_mode<synchronous>, transform_indices = @transform_4, window_bounds = array<i64: 1, 32>}, {transform_indices = @transform_5, window_bounds = array<i64: 8, 32>}]} {
    %c0_i32 = arith.constant 0 : i32
    %0 = arith.cmpi eq, %arg1, %c0_i32 : i32
    %1 = arith.extui %0 : i1 to i32
    %c0_i32_0 = arith.constant 0 : i32
    %2 = arith.cmpi ne, %1, %c0_i32_0 : i32
    scf.if %2 {
      %cst_18 = arith.constant 0.000000e+00 : f32
      %25 = vector.broadcast %cst_18 : f32 to vector<8x32xf32>
      %c0_19 = arith.constant 0 : index
      %c0_20 = arith.constant 0 : index
      %26 = vector.load %arg7[%c0_19, %c0_20] : memref<8x32xf32, #tpu.memory_space<vmem>>, vector<8x32xf32>
      tpu.vector_store %arg7[%c0_19, %c0_20], %25 {strides = array<i32>} : memref<8x32xf32, #tpu.memory_space<vmem>>, vector<8x32xf32>,
    } else {
    }
    %c0 = arith.constant 0 : index
    %c0_1 = arith.constant 0 : index
    %3 = vector.load %arg2[%c0, %c0_1] : memref<8x32xf32, #tpu.memory_space<vmem>>, vector<8x32xf32>
    %c0_2 = arith.constant 0 : index
    %c0_3 = arith.constant 0 : index
    %4 = vector.load %arg3[%c0_2, %c0_3] : memref<32x128xf32, #tpu.memory_space<vmem>>, vector<32x128xf32>
    %cst = arith.constant dense<0.000000e+00> : vector<8x128xf32>
    %5 = tpu.matmul %3, %4, %cst {dimension_numbers = #tpu.dot_dimension_numbers<[1], [0], [0], [1], [0, 0, 1, 1], [], []>} : vector<8x32xf32>, vector<32x128xf32>, vector<8x128xf32> -> vector<8x128xf32>
    %c0_4 = arith.constant 0 : index
    %c0_5 = arith.constant 0 : index
    %6 = vector.load %arg4[%c0_4, %c0_5] : memref<1x128xf32, #tpu.memory_space<vmem>>, vector<1x128xf32>
    %7 = vector.broadcast %6 : vector<1x128xf32> to vector<8x128xf32>
    %8 = arith.addf %5, %7 : vector<8x128xf32>
    %cst_6 = arith.constant 5.000000e-01 : f32
    %9 = vector.broadcast %cst_6 : f32 to vector<8x128xf32>
    %10 = arith.mulf %9, %8 : vector<8x128xf32>
    %cst_7 = arith.constant 0.707106769 : f32
    %11 = vector.broadcast %cst_7 : f32 to vector<8x128xf32>
    %12 = arith.mulf %8, %11 : vector<8x128xf32>
    %13 = math.erf %12 : vector<8x128xf32>
    %cst_8 = arith.constant 1.000000e+00 : f32
    %14 = vector.broadcast %cst_8 : f32 to vector<8x128xf32>
    %15 = arith.addf %14, %13 : vector<8x128xf32>
    %16 = arith.mulf %10, %15 : vector<8x128xf32>
    %c0_9 = arith.constant 0 : index
    %c0_10 = arith.constant 0 : index
    %17 = vector.load %arg5[%c0_9, %c0_10] : memref<128x32xf32, #tpu.memory_space<vmem>>, vector<128x32xf32>
    %c0_11 = arith.constant 0 : index
    %c0_12 = arith.constant 0 : index
    %18 = vector.load %arg7[%c0_11, %c0_12] : memref<8x32xf32, #tpu.memory_space<vmem>>, vector<8x32xf32>
    %cst_13 = arith.constant dense<0.000000e+00> : vector<8x32xf32>
    %19 = tpu.matmul %16, %17, %cst_13 {dimension_numbers = #tpu.dot_dimension_numbers<[1], [0], [0], [1], [0, 0, 1, 1], [], []>} : vector<8x128xf32>, vector<128x32xf32>, vector<8x32xf32> -> vector<8x32xf32>
    %20 = arith.addf %18, %19 : vector<8x32xf32>
    %c0_14 = arith.constant 0 : index
    %c0_15 = arith.constant 0 : index
    %21 = vector.load %arg7[%c0_14, %c0_15] : memref<8x32xf32, #tpu.memory_space<vmem>>, vector<8x32xf32>
    tpu.vector_store %arg7[%c0_14, %c0_15], %20 {strides = array<i32>} : memref<8x32xf32, #tpu.memory_space<vmem>>, vector<8x32xf32>,
    %c0_i32_16 = arith.constant 0 : i32
    %22 = arith.cmpi eq, %arg1, %c0_i32_16 : i32
    %23 = arith.extui %22 : i1 to i32
    %c0_i32_17 = arith.constant 0 : i32
    %24 = arith.cmpi ne, %23, %c0_i32_17 : i32
    scf.if %24 {
      %c0_18 = arith.constant 0 : index
      %c0_19 = arith.constant 0 : index
      %25 = vector.load %arg7[%c0_18, %c0_19] : memref<8x32xf32, #tpu.memory_space<vmem>>, vector<8x32xf32>
      %c0_20 = arith.constant 0 : index
      %c0_21 = arith.constant 0 : index
      %26 = vector.load %arg6[%c0_20, %c0_21] : memref<1x32xf32, #tpu.memory_space<vmem>>, vector<1x32xf32>
      %27 = vector.broadcast %26 : vector<1x32xf32> to vector<8x32xf32>
      %28 = arith.addf %25, %27 : vector<8x32xf32>
      %c0_22 = arith.constant 0 : index
      %c0_23 = arith.constant 0 : index
      %29 = vector.load %arg7[%c0_22, %c0_23] : memref<8x32xf32, #tpu.memory_space<vmem>>, vector<8x32xf32>
      tpu.vector_store %arg7[%c0_22, %c0_23], %28 {strides = array<i32>} : memref<8x32xf32, #tpu.memory_space<vmem>>, vector<8x32xf32>,
    } else {
    }
    return
  }
  func.func @transform_0(%arg0: i32, %arg1: i32) -> (i32, i32) {
    %c0_i32 = arith.constant 0 : i32
    %c0_i32_0 = arith.constant 0 : i32
    return %arg0, %c0_i32 : i32, i32
  }
  func.func @transform_1(%arg0: i32, %arg1: i32) -> (i32, i32) {
    %c0_i32 = arith.constant 0 : i32
    %c0_i32_0 = arith.constant 0 : i32
    return %c0_i32, %arg1 : i32, i32
  }
  func.func @transform_2(%arg0: i32, %arg1: i32) -> (i32, i32) {
    %c0_i32 = arith.constant 0 : i32
    %c0_i32_0 = arith.constant 0 : i32
    return %c0_i32, %arg1 : i32, i32
  }
  func.func @transform_3(%arg0: i32, %arg1: i32) -> (i32, i32) {
    %c0_i32 = arith.constant 0 : i32
    %c0_i32_0 = arith.constant 0 : i32
    return %arg1, %c0_i32 : i32, i32
  }
  func.func @transform_4(%arg0: i32, %arg1: i32) -> (i32, i32) {
    %c0_i32 = arith.constant 0 : i32
    %c0_i32_0 = arith.constant 0 : i32
    %c0_i32_1 = arith.constant 0 : i32
    return %c0_i32, %c0_i32_0 : i32, i32
  }
  func.func @transform_5(%arg0: i32, %arg1: i32) -> (i32, i32) {
    %c0_i32 = arith.constant 0 : i32
    %c0_i32_0 = arith.constant 0 : i32
    return %arg0, %c0_i32 : i32, i32
  }
}

</mosaic_0001>

<bundles_post_ra>
// kernel: tpu_custom_call.1
= control target key start
LH: loop header
LB: loop body
LE: loop exit
PB: predicated region body
PF: predicated region fallthrough
CT: control target
= control target key end

     0   :  { %10 = vsyncpa [#allocation3], 0  ;;  %s912_s0 = inlined_call_operand.vmem [shape: f32[16,32], index: 0, kind: input, shape index: {}]   ;;  %s913_s1 = inlined_call_operand.vmem [shape: f32[32,128], index: 1, kind: input, shape index: {}]   ;;  %s914_s2 = inlined_call_operand.vmem [shape: f32[1,128], index: 2, kind: input, shape index: {}]   ;;  %s915_s3 = inlined_call_operand.vmem [shape: f32[128,32], index: 3, kind: input, shape index: {}]   ;;  %s916_s4 = inlined_call_operand.vmem [shape: f32[1,32], index: 4, kind: input, shape index: {}]   ;;  %s917_s5 = inlined_call_operand.hbm [shape: f32[16,32], index: 5, kind: output, shape index: {}]  }
   0x1   :  { %12 = vsyncpa [#allocation3 + $0x1], 0  ;;  %s729_s18 = smov 0   ;;  %s731_s19 = smov 0  }
   0x2   :  { %s733_s20 = smov 0   ;;  %s735_s21 = smov 0  }
   0x3   :  { %s737_s22 = smov 0   ;;  %s739_s23 = smov 0  }
   0x4 LB: > { %s542_s24 = sadd.s32 4294967295, %s696_s23   ;;  %s543_s25 = sadd.s32 4294967294, %s696_s23   ;;  %s696_s23 = sphi %s739_s23, %s18_s23   ;;  %s692_s22 = sphi %s737_s22, %s924_s22   ;;  %s688_s21 = sphi %s735_s21, %s923_s21   ;;  %s684_s20 = sphi %s733_s20, %s922_s20   ;;  %s680_s19 = sphi %s731_s19, %s921_s19   ;;  %s676_s18 = sphi %s729_s18, %s920_s18  }
   0x5   : > { %s30_s26 = sadd.s32 1, %s692_s22  ;;  %s162_s27 = sadd.s32 1, %s684_s20 }
   0x6   : > { %p32_p0 = scmp.ge.s32.totalorder %s30_s26, 2  ;;  %p172_p1 = scmp.ne.s32.totalorder %s684_s20, %s680_s19 }
   0x7   : > { %p173_p2 = scmp.eq.s32.totalorder %s542_s24, 1  ;;  %p178_p3 = scmp.ne.s32.totalorder %s680_s19, %s676_s18 }
   0x8   : > { %s926_s26 = smov (%p32_p0, %s30_s26), 0  ;;  %p179_p5 = scmp.eq.s32.totalorder %s543_s25, 1 }
   0x9   : > { %p769_p4 = por %p173_p2, %p172_p1  ;;  %s159_s29 = ssub.s32 %s692_s22, %s926_s26 }
   0xa   : > { %p549_p6 = scmp.ge.s32.totalorder %s696_s23, 1  ;;  %p160_p7 = scmp.eq.s32.totalorder %s159_s29, 0 }
   0xb   : > { %p776_p8 = por %p179_p5, %p178_p3  ;;  %p229_p9 = scmp.lt.s32.totalorder %s696_s23, 3 }
   0xc   : > { %s782_s6 = scalar_select %p160_p7, %s684_s20, %s162_s27  }
   0xd   : > { %p230_p10 = pnand %p549_p6, %p229_p9 }
   0xe   : > { %p268_p11 = scmp.lt.s32.totalorder (!%p230_p10), %s688_s21, 1  ;;  %s265_s27 = sand.u32 (!%p230_p10), 1, %s680_s19  }
   0xf   : > { %233 = sbr.rel (%p230_p10) target bundleno = 348 (0x15c), region = 40  ;;  %s550_s8 = sshll.u32 (!%p230_p10), %s265_s27, 3 }
  0x10   : > { %s859_s11 = scalar_lea.vmem (!%p230_p10), [#allocation2], %s550_s8  ;;  %s555_s12 = sshll.u32 (!%p230_p10), %s688_s21, 3 }
  0x11   : > { %s428_s15 = scalar_lea.hbm (!%p230_p10), %s917_s5, %s555_s12  ;;  %s430_s24 = sshll.u32 (!%p230_p10), %s859_s11, 4  ;;  %s431_s24 = int_to_ptr.vmem [resolvable:$true] %s430_s24 }
  0x12   : > { %s638_s10 = scalar_lea.hbm (!%p230_p10), %s917_s5, 16 }
  0x14   : > { %v295_v0 = vld [vmem:[%s913_s1 + $0x18] sm:$0xff]  ;;  %v294_v1 = vld [vmem:[%s913_s1 + $0x10] sm:$0xff]  ;;  %v293_v2 = vld [vmem:[%s913_s1 + $0x8] sm:$0xff]  ;;  %s269_s13 = scalar_select %p268_p11, %s688_s21, 1  ;;  %vm289_vm0 = vcmask 261120   ;;  %v698_v40 = vmov 0.0  }
  0x15   : > { %316 = vmatpush.msra.mxu0 %v295_v0  ;;  %v292_v3 = vld [vmem:[%s913_s1] sm:$0xff]  ;;  %v383_v5 = vld [vmem:[%s915_s3 + $0x78] sm:$0xff]  ;;  %v382_v6 = vld [vmem:[%s915_s3 + $0x70] sm:$0xff]  ;;  %290 = vst.msk [vmem:[%s859_s11] sm:$0xff] %vm289_vm0, %v698_v40  ;;  %s418_s21 = scalar_lea.sflag [#allocation3], %s265_s27 }
  0x16   : > { %s551_s16 = sshll.u32 %s269_s13, 3  ;;  %385 = vmatpush.msra.mxu1 %v383_v5  ;;  %v381_v7 = vld [vmem:[%s915_s3 + $0x68] sm:$0xff]  ;;  %v380_v8 = vld [vmem:[%s915_s3 + $0x60] sm:$0xff]  ;;  %v379_v10 = vld [vmem:[%s915_s3 + $0x58] sm:$0xff] }
  0x17   : > { %317 = vmatpush.msra.mxu0 %v294_v1  ;;  %s271_s25 = scalar_lea.vmem %s912_s0, %s551_s16  ;;  %v614_v9 = vld [vmem:[%s914_s2] ss:$0 sm:$0xff]  ;;  %v378_v11 = vld [vmem:[%s915_s3 + $0x50] sm:$0xff]  ;;  %v377_v13 = vld [vmem:[%s915_s3 + $0x48] sm:$0xff] }
  0x18   : > { %v291_v4 = vld [vmem:[%s271_s25] sm:$0xff]  ;;  %386 = vmatpush.msra.mxu1 %v382_v6  ;;  %v375_v17 = vld [vmem:[%s915_s3 + $0x38] sm:$0xff]  ;;  %v374_v19 = vld [vmem:[%s915_s3 + $0x30] sm:$0xff]  ;;  %s432_s25 = sshll.u32 %s428_s15, 4  ;;  %s433_s25 = int_to_ptr.hbm [resolvable:$true] %s432_s25 }
  0x19   : > { %318 = vmatpush.msra.mxu0 %v293_v2  ;;  %v376_v15 = vld [vmem:[%s915_s3 + $0x40] sm:$0xff]  ;;  %v373_v21 = vld [vmem:[%s915_s3 + $0x28] sm:$0xff]  ;;  %v371_v27 = vld [vmem:[%s915_s3 + $0x18] sm:$0xff]  ;;  %s632_s29 = sshra.s32 %s433_s25, 4  ;;  %s633_s29 = int_to_ptr.hbm [resolvable:$true] %s632_s29 }
  0x1a   : > { %387 = vmatpush.msra.mxu1 %v381_v7  ;;  %v372_v24 = vld [vmem:[%s915_s3 + $0x20] sm:$0xff]  ;;  %v370_v30 = vld [vmem:[%s915_s3 + $0x10] sm:$0xff]  ;;  %v369_v33 = vld [vmem:[%s915_s3 + $0x8] sm:$0xff]  ;;  %s634_s7 = scalar_lea.hbm %s633_s29, 8  ;;  %p639_p1 = scmp.lt.s32.totalorder %s633_s29, %s917_s5 }
  0x1b   : > { %319 = vmatpush.msra.mxu0 %v292_v3  ;;  %v368_v35 = vld [vmem:[%s915_s3] sm:$0xff]  ;;  %p635_p12 = scmp.ne.s32.totalorder %s633_s29, %s634_s7  ;;  %p640_p2 = scmp.lt.s32.totalorder %s638_s10, %s634_s7 }
  0x1c   : > { %552 = vmatmul.msk.f32.vlgmr.msra.gmra.mxu0 %vm289_vm0, %v291_v4  ;;  %388 = vmatpush.msra.mxu1 %v380_v8  ;;  %v384_v0 = vld [vmem:[%s859_s11] sm:$0xff] }
  0x1d   : > { %v615_v3 = vld [vmem:[%s916_s4] ss:$0 sm:$0xff]  ;;  %p636_p13 = pnand %p635_p12, %p769_p4  ;;  %p641_p3 = por %p640_p2, %p639_p1 }
  0x1e   : > { %389 = vmatpush.msra.mxu1 %v379_v10 }
  0x1f   : > { %p637_p0 = pneg %p636_p13 }
  0x20   : > { %390 = vmatpush.msra.mxu1 %v378_v11 }
  0x21   : > { %p642_p5 = pnand %p641_p3, %p637_p0 }
  0x22   : > { %391 = vmatpush.msra.mxu1 %v377_v13 }
  0x24   : > { %392 = vmatpush.msra.mxu1 %v376_v15 }
  0x26   : > { %393 = vmatpush.msra.mxu1 %v375_v17 }
  0x28   : > { %394 = vmatpush.msra.mxu1 %v374_v19 }
  0x2a   : > { %395 = vmatpush.msra.mxu1 %v373_v21 }
  0x2c   : > { %396 = vmatpush.msra.mxu1 %v372_v24 }
  0x2e   : > { %397 = vmatpush.msra.mxu1 %v371_v27 }
  0x30   : > { %398 = vmatpush.msra.mxu1 %v370_v30 }
  0x32   : > { %399 = vmatpush.msra.mxu1 %v369_v33 }
  0x34   : > { %400 = vmatpush.msra.mxu1 %v368_v35 }
  0x99   : > { %v321_v12 = vpop.f32.mrf.mxu0 }
  0x9a   : > { %v826_v14 = vadd.f32 %v614_v9, %v321_v12 }
  0x9c   : > { %v325_v16 = vmul.f32 0.70710677, %v826_v14  ;;  %v324_v61 = vmul.f32 0.5, %v826_v14 }
  0x9e   : > { %v326_v18 = vmul.f32 %v325_v16, %v325_v16 }
  0xa0   : > { %v327_v20 = vmin.f32 %v326_v18, 16.0 }
  0xa2   : > { %v328_v22 = vmul.f32 2.1237322e-06, %v327_v20  ;;  %v339_v23 = vmul.f32 3.8918573e-05, %v327_v20 }
  0xa4   : > { %v329_v25 = vadd.f32 0.00028619796, %v328_v22  ;;  %v340_v26 = vadd.f32 0.001143296, %v339_v23 }
  0xa6   : > { %v330_v28 = vmul.f32 %v329_v25, %v327_v20  ;;  %v341_v29 = vmul.f32 %v340_v26, %v327_v20 }
  0xa8   : > { %v342_v31 = vadd.f32 0.014752088, %v341_v29  ;;  %v331_v32 = vadd.f32 0.0036580483, %v330_v28 }
  0xaa   : > { %v343_v34 = vmul.f32 %v342_v31, %v327_v20  ;;  %v332_v37 = vmul.f32 %v331_v32, %v327_v20 }
  0xac   : > { %v344_v36 = vadd.f32 0.112945676, %v343_v34  ;;  %v333_v41 = vadd.f32 0.05243302, %v332_v37 }
  0xae   : > { %v345_v38 = vmul.f32 %v344_v36, %v327_v20  ;;  %v334_v44 = vmul.f32 %v333_v41, %v327_v20 }
  0xb0   : > { %v346_v39 = vadd.f32 0.4994258, %v345_v38  ;;  %v335_v45 = vadd.f32 0.18741608, %v334_v44 }
  0xb2   : > { %v347_v42 = vmul.f32 %v346_v39, %v327_v20  ;;  %v336_v47 = vmul.f32 %v335_v45, %v327_v20 }
  0xb4   : > { %v348_v43 = vadd.f32 1.0, %v347_v42  ;;  %v337_v51 = vadd.f32 1.1283791, %v336_v47 }
  0xb6   : > { %616 = vrcp.f32 %v348_v43  ;;  %v360_v50 = vand.u32 2147483648, %v348_v43  ;;  %v358_v53 = vand.u32 2147483647, %v348_v43  ;;  %vm354_vm2 = vweird.f32 %v348_v43 }
  0xb7   : > { %v338_v56 = vmul.f32 %v337_v51, %v325_v16 }
  0xb8   : > { %v361_v55 = vor.u32 1.1754944e-38, %v360_v50  ;;  %vm359_vm4 = vcmp.eq.f32.partialorder %v358_v53, 8.507059e+37 }
  0xbc   : > { %v617_v46 = vpop.eup %616 }
  0xbd   : > { %v350_v48 = vmul.f32 %v617_v46, %v348_v43  ;;  %vm355_vm1 = vweird.f32 %v617_v46 }
  0xbe   : > { %vm356_vm3 = vmor %vm354_vm2, %vm355_vm1 }
  0xbf   : > { %v351_v49 = vsub.f32 1.0, %v350_v48 }
  0xc1   : > { %v352_v52 = vmul.f32 %v617_v46, %v351_v49 }
  0xc3   : > { %v353_v54 = vadd.f32 %v617_v46, %v352_v52 }
  0xc5   : > { %v357_v57 = vsel %vm356_vm3, %v617_v46, %v353_v54 }
  0xc6   : > { %v362_v58 = vsel %vm359_vm4, %v361_v55, %v357_v57 }
  0xc7   : > { %v363_v59 = vmul.f32 %v362_v58, %v338_v56 }
  0xc9   : > { %v553_v60 = vclamps-f32 %v363_v59, 1.0 }
  0xcb   : > { %v366_v62 = vadd.f32 1.0, %v553_v60 }
  0xcd   : > { %v367_v63 = vmul.f32 %v366_v62, %v324_v61 }
  0xcf   : > { %401 = vmatmul.f32.vlgmr.msra.gmra.mxu1 %v367_v63 }
 0x14c   : > { %v402_v1 = vpop.f32.mrf.mxu1 }
 0x14d   : > { %v405_v2 = vadd.f32 %v402_v1, %v384_v0 }
 0x14f   : > { %406 = vst.msk [vmem:[%s859_s11] sm:$0xff] %vm289_vm0, %v405_v2 }
 0x156   : > { %v410_v4 = vld [vmem:[%s859_s11] sm:$0xff] }
 0x157   : > { %v415_v5 = vadd.f32 %v615_v3, %v410_v4 }
 0x159   : > { %416 = vst.msk [vmem:[%s859_s11] sm:$0xff] %vm289_vm0, %v415_v5 }
 0x15a   : > { %645 = shalt.err (!%p642_p5)
}
 0x15b   : > { %558 = dma.vmem_to_hbm [thread:$0]  (%p769_p4), %s431_s24, 128, %s433_s25, %s418_s21  }
 0x15c PF: > { %p564_p6 = scmp.ge.s32.totalorder %s696_s23, 2  ;;  %s444_s27 = sand.u32 1, %s676_s18  }
 0x15d   : > { %s445_s11 = scalar_lea.sflag [#allocation3], %s444_s27 }
 0x15e   : > { %p561_p7 = pnand %p564_p6, %p776_p8 }
 0x160   : > { %p562_p9 = pneg %p561_p7 }
 0x162   : > { %671 = dma.done.wait (%p562_p9), %s445_s11, 128  }
 0x163   : > { %673 = vsyncadd (%p562_p9), %s445_s11, 4294967168  ;;  %s18_s23 = sadd.s32 1, %s696_s23   ;;  %s920_s18 = smov %s680_s19 }
 0x164   : > { %p15_p10 = scmp.ge.s32.totalorder %s18_s23, 4   ;;  %s921_s19 = smov %s684_s20 }
 0x165   : > { %s922_s20 = smov %s782_s6  ;;  %s923_s21 = smov %s692_s22 }
 0x166   : > { %s924_s22 = smov %s926_s26  ;;  %17 = sbr.rel (!%p15_p10) target bundleno = 4 (0x4), region = 92 }
 0x16b   :  { %451 = vsyncpa [#allocation3], 1 }
 0x16c   :  { %453 = vsyncpa [#allocation3 + $0x1], 1 }

</bundles_post_ra>
